<compile_context>
chip_gen: v6e
topology: v6e:2x2x1
jax: 0.10.0
libtpu: 0.0.40
codegen_flags: <defaults>
</compile_context>

<pallas_src>
import jax
import jax.numpy as jnp
from jax.experimental import pallas as pl
from jax.experimental.pallas import tpu as pltpu

NEG_FILL = -1000000000.0  # value PyTorch writes where attention_mask == 0

# Small demo sizes (original HIDDEN_SIZE = 1024; shrunk for the synthetic script,
# kept at a lane-friendly multiple of 128).
BATCH = 2
SEQ = 8
HIDDEN = 128
VOCAB = 64


def _fused_head_kernel(ids_ref, mask_ref, table_ref, w_ref, bias_ref, out_ref):
    """One batch-block per grid step.

    ids_ref:   (BB*S, 1) int32 VMEM -- token ids, one per sublane row
    mask_ref:  (BB*S, 1) int32 VMEM -- attention mask, one per sublane row
    table_ref: (V, H)    f32   VMEM -- embedding table (backbone stand-in), resident
    w_ref:     (1, H)    f32   VMEM -- nn.Linear(H, 1) weight as a lane-dense row
    bias_ref:  (1,)      f32   SMEM -- bias (scalar read, no (1,1) VMEM block)
    out_ref:   (1, BB)   f32   VMEM -- logits with batch mapped to lanes
    """
    N = ids_ref.shape[0]            # BB * S
    V, H = table_ref.shape
    BB = out_ref.shape[1]
    S = N // BB

    # --- 1) One-hot MXU gather: a single matmul replaces N serialized (1,H) row loads.
    ids = jnp.clip(ids_ref[...], 0, V - 1)                        # (N, 1) (XLA-gather-like clamp)
    iota_v = jax.lax.broadcasted_iota(jnp.int32, (N, V), 1)       # (N, V)
    one_hot = (iota_v == ids).astype(table_ref.dtype)             # (N, V), one compare
    gathered = jnp.dot(one_hot, table_ref[...],
                       preferred_element_type=jnp.float32)        # (N, H) f32

    # --- 2) Single tile-wide masked fill (one broadcast, one select).
    keep = mask_ref[...] != 0                                     # (N, 1)
    filled = jnp.where(keep, gathered, jnp.float32(NEG_FILL))     # (N, H)

    # --- 3) Max over the sequence axis: free reshape + one sublane (XLU) reduce per row.
    pooled = jnp.max(filled.reshape(BB, S, H), axis=1)            # (BB, H) f32

    # --- 4) (H -> 1) head: VPU multiply + lane reduce (no degenerate MXU matmul),
    #        emitted lane-dense with batch along lanes, stored once as a full block.
    logits = jnp.sum(pooled * w_ref[...], axis=-1) + bias_ref[0]  # (BB,)
    out_ref[...] = logits.reshape(1, BB).astype(out_ref.dtype)    # (1, BB)


def max_pooling_head(input_ids, attention_mask, embed_table, weight, bias):
    """Pallas implementation of: backbone stand-in -> masked fill -> max over seq
    -> Linear(H, 1) -> squeeze."""
    B, S = input_ids.shape
    V, H = embed_table.shape

    # Batch rows per grid step. == B at demo scale; raise (e.g. 8+) and let the grid
    # tile batch when B grows -- the axis is already marked "parallel" for megacore.
    BB = B
    grid = (pl.cdiv(B, BB),)

    # Ids / mask pre-shaped so each token occupies one sublane row (no in-kernel relayout).
    ids_col = input_ids.astype(jnp.int32).reshape(B * S, 1)
    mask_col = attention_mask.astype(jnp.int32).reshape(B * S, 1)
    w_row = weight.reshape(1, H).astype(jnp.float32)    # torch nn.Linear weight is (1, H)
    b_vec = bias.reshape(1).astype(jnp.float32)

    out = pl.pallas_call(
        _fused_head_kernel,
        out_shape=jax.ShapeDtypeStruct((1, B), jnp.float32),      # lane-dense: batch -> lanes
        grid_spec=pltpu.PrefetchScalarGridSpec(
            num_scalar_prefetch=0,
            grid=grid,
            in_specs=[
                pl.BlockSpec((BB * S, 1), lambda i: (i, 0)),      # token ids
                pl.BlockSpec((BB * S, 1), lambda i: (i, 0)),      # attention mask
                pl.BlockSpec((V, H), lambda i: (0, 0)),           # embedding table (resident)
                pl.BlockSpec((1, H), lambda i: (0, 0)),           # linear weight row (resident)
                pl.BlockSpec(memory_space=pltpu.MemorySpace.SMEM),  # bias scalar in SMEM
            ],
            out_specs=pl.BlockSpec((1, BB), lambda i: (0, i)),
        ),
        compiler_params=pltpu.CompilerParams(
            dimension_semantics=("parallel",),
            vmem_limit_bytes=32 * 1024 * 1024),
    )(ids_col, mask_col, embed_table.astype(jnp.float32), w_row, b_vec)
    return out[0, :B]   # preds, shape (B,)  (== logits.squeeze(-1).squeeze(-1))


def max_pooling_model_forward(input_ids, attention_mask, params, labels=None):
    preds = max_pooling_head(input_ids, attention_mask, params["embed_table"],
                             params["linear_w"], params["linear_b"])
    if labels is not None:
        # nn.MSELoss on the flattened preds/labels (trivial glue, size-B reduction).
        return jnp.mean((preds.astype(jnp.float32) - labels.astype(jnp.float32)) ** 2)
    return preds


def _reference_forward(input_ids, attention_mask, params):
    """Pure-JAX reference matching the PyTorch semantics."""
    h = params["embed_table"].astype(jnp.float32)[input_ids]            # (B, S, H)
    m = attention_mask[..., None]                                       # (B, S, 1)
    h = jnp.where(m == 0, jnp.float32(NEG_FILL), h)
    pooled = jnp.max(h, axis=1)                                         # (B, H)
    w = params["linear_w"].reshape(1, HIDDEN).astype(jnp.float32)
    logits = jnp.sum(pooled * w, axis=-1) + params["linear_b"].astype(jnp.float32)[0]
    return logits


if __name__ == "__main__":
    key = jax.random.PRNGKey(0)
    k_emb, k_w, k_b, k_ids, k_lab = jax.random.split(key, 5)

    params = {
        # Synthetic stand-in for the transformer backbone output.
        "embed_table": jax.random.normal(k_emb, (VOCAB, HIDDEN), jnp.float32) * 0.5,
        # nn.Linear(HIDDEN_SIZE, 1): weight (1, H), bias (1,)
        "linear_w": jax.random.normal(k_w, (1, HIDDEN), jnp.float32) * 0.02,
        "linear_b": jax.random.normal(k_b, (1,), jnp.float32) * 0.02,
    }

    input_ids = jax.random.randint(k_ids, (BATCH, SEQ), 0, VOCAB, dtype=jnp.int32)
    # Padding on the tail of the second example to exercise the masked fill.
    attention_mask = jnp.array(
        [[1, 1, 1, 1, 1, 1, 1, 1],
         [1, 1, 1, 1, 1, 0, 0, 0]], dtype=jnp.int32)
    labels = jax.random.normal(k_lab, (BATCH,), jnp.float32)

    preds = jax.block_until_ready(
        max_pooling_model_forward(input_ids, attention_mask, params))
    loss = jax.block_until_ready(
        max_pooling_model_forward(input_ids, attention_mask, params, labels=labels))

    ref = _reference_forward(input_ids, attention_mask, params)
    assert preds.shape == (BATCH,)
    assert jnp.allclose(preds, ref, atol=1e-4, rtol=1e-4), (preds, ref)
    assert jnp.isfinite(loss)

    print("KERNEL_OK")
</pallas_src>

<mosaic_0001>
module attributes {stable_mosaic.version = 11 : i64} {
  func.func @_fused_head_kernel(%arg0: i32, %arg1: memref<16x1xi32, #tpu.memory_space<vmem>>, %arg2: memref<16x1xi32, #tpu.memory_space<vmem>>, %arg3: memref<64x128xf32, #tpu.memory_space<vmem>>, %arg4: memref<1x128xf32, #tpu.memory_space<vmem>>, %arg5: memref<1xf32, #tpu.memory_space<smem>>, %arg6: memref<1x2xf32, #tpu.memory_space<vmem>>) attributes {dimension_semantics = [#tpu.dimension_semantics<parallel>], iteration_bounds = array<i64: 1>, scalar_prefetch = 0 : i64, scratch_operands = 0 : i64, tpu.core_type = #tpu.core_type<tc>, window_params = [{transform_indices = @transform_0, window_bounds = array<i64: 16, 1>}, {transform_indices = @transform_1, window_bounds = array<i64: 16, 1>}, {pipeline_mode = #tpu.pipeline_mode<synchronous>, transform_indices = @transform_2, window_bounds = array<i64: 64, 128>}, {pipeline_mode = #tpu.pipeline_mode<synchronous>, transform_indices = @transform_3, window_bounds = array<i64: 1, 128>}, {transform_indices = @transform_4, window_bounds = array<i64: 1>}, {transform_indices = @transform_5, window_bounds = array<i64: 1, 2>}]} {
    %c0 = arith.constant 0 : index
    %c0_0 = arith.constant 0 : index
    %0 = vector.load %arg1[%c0, %c0_0] : memref<16x1xi32, #tpu.memory_space<vmem>>, vector<16x1xi32>
    %c0_i32 = arith.constant 0 : i32
    %c63_i32 = arith.constant 63 : i32
    %1 = vector.broadcast %c0_i32 : i32 to vector<16x1xi32>
    %2 = arith.maxsi %1, %0 : vector<16x1xi32>
    %3 = vector.broadcast %c63_i32 : i32 to vector<16x1xi32>
    %4 = arith.minsi %3, %2 : vector<16x1xi32>
    %5 = tpu.iota {dimensions = array<i32: 1>} : vector<16x64xi32>
    %6 = vector.broadcast %4 : vector<16x1xi32> to vector<16x64xi32>
    %7 = arith.cmpi eq, %5, %6 : vector<16x64xi32>
    %8 = arith.extui %7 : vector<16x64xi1> to vector<16x64xi32>
    %9 = arith.sitofp %8 : vector<16x64xi32> to vector<16x64xf32>
    %c0_1 = arith.constant 0 : index
    %c0_2 = arith.constant 0 : index
    %10 = vector.load %arg3[%c0_1, %c0_2] : memref<64x128xf32, #tpu.memory_space<vmem>>, vector<64x128xf32>
    %cst = arith.constant dense<0.000000e+00> : vector<16x128xf32>
    %11 = tpu.matmul %9, %10, %cst {dimension_numbers = #tpu.dot_dimension_numbers<[1], [0], [0], [1], [0, 0, 1, 1], [], []>} : vector<16x64xf32>, vector<64x128xf32>, vector<16x128xf32> -> vector<16x128xf32>
    %c0_3 = arith.constant 0 : index
    %c0_4 = arith.constant 0 : index
    %12 = vector.load %arg2[%c0_3, %c0_4] : memref<16x1xi32, #tpu.memory_space<vmem>>, vector<16x1xi32>
    %c0_i32_5 = arith.constant 0 : i32
    %13 = vector.broadcast %c0_i32_5 : i32 to vector<16x1xi32>
    %14 = arith.cmpi ne, %12, %13 : vector<16x1xi32>
    %cst_6 = arith.constant -1.000000e+09 : f32
    %15 = vector.shape_cast %14 : vector<16x1xi1> to vector<16x1xi1>
    %16 = vector.broadcast %15 : vector<16x1xi1> to vector<16x128xi1>
    %17 = vector.broadcast %cst_6 : f32 to vector<16x128xf32>
    %18 = arith.select %16, %11, %17 : vector<16x128xi1>, vector<16x128xf32>
    %19 = vector.shape_cast %18 : vector<16x128xf32> to vector<2x8x128xf32>
    %cst_7 = arith.constant dense<0xFF800000> : vector<2x128xf32>
    %20 = vector.multi_reduction <maximumf>, %19, %cst_7 [1] : vector<2x8x128xf32> to vector<2x128xf32>
    %c0_8 = arith.constant 0 : index
    %c0_9 = arith.constant 0 : index
    %21 = vector.load %arg4[%c0_8, %c0_9] : memref<1x128xf32, #tpu.memory_space<vmem>>, vector<1x128xf32>
    %22 = vector.broadcast %21 : vector<1x128xf32> to vector<2x128xf32>
    %23 = arith.mulf %20, %22 : vector<2x128xf32>
    %cst_10 = arith.constant dense<0.000000e+00> : vector<2xf32>
    %24 = vector.multi_reduction <add>, %23, %cst_10 [1] : vector<2x128xf32> to vector<2xf32>
    %c0_11 = arith.constant 0 : index
    %25 = memref.load %arg5[%c0_11] : memref<1xf32, #tpu.memory_space<smem>>
    %26 = vector.broadcast %25 : f32 to vector<2xf32>
    %27 = arith.addf %24, %26 : vector<2xf32>
    %28 = vector.shape_cast %27 : vector<2xf32> to vector<1x2xf32>
    %c0_12 = arith.constant 0 : index
    %c0_13 = arith.constant 0 : index
    %29 = vector.load %arg6[%c0_12, %c0_13] : memref<1x2xf32, #tpu.memory_space<vmem>>, vector<1x2xf32>
    tpu.vector_store %arg6[%c0_12, %c0_13], %28 {strides = array<i32>} : memref<1x2xf32, #tpu.memory_space<vmem>>, vector<1x2xf32>,
    return
  }
  func.func @transform_0(%arg0: i32) -> (i32, i32) {
    %c0_i32 = arith.constant 0 : i32
    %c0_i32_0 = arith.constant 0 : i32
    return %arg0, %c0_i32 : i32, i32
  }
  func.func @transform_1(%arg0: i32) -> (i32, i32) {
    %c0_i32 = arith.constant 0 : i32
    %c0_i32_0 = arith.constant 0 : i32
    return %arg0, %c0_i32 : i32, i32
  }
  func.func @transform_2(%arg0: i32) -> (i32, i32) {
    %c0_i32 = arith.constant 0 : i32
    %c0_i32_0 = arith.constant 0 : i32
    %c0_i32_1 = arith.constant 0 : i32
    return %c0_i32, %c0_i32_0 : i32, i32
  }
  func.func @transform_3(%arg0: i32) -> (i32, i32) {
    %c0_i32 = arith.constant 0 : i32
    %c0_i32_0 = arith.constant 0 : i32
    %c0_i32_1 = arith.constant 0 : i32
    return %c0_i32, %c0_i32_0 : i32, i32
  }
  func.func @transform_4(%arg0: i32) -> i32 {
    %c0_i32 = arith.constant 0 : i32
    %c0_i32_0 = arith.constant 0 : i32
    return %c0_i32 : i32
  }
  func.func @transform_5(%arg0: i32) -> (i32, i32) {
    %c0_i32 = arith.constant 0 : i32
    %c0_i32_0 = arith.constant 0 : i32
    return %c0_i32, %arg0 : i32, i32
  }
}

</mosaic_0001>

<bundles_post_ra>
// kernel: tpu_custom_call.1
= control target key start
LH: loop header
LB: loop body
LE: loop exit
PB: predicated region body
PF: predicated region fallthrough
CT: control target
= control target key end

     0   :  { %11 = vsyncpa [#allocation4], 0  ;;  %s369_s0 = inlined_call_operand.vmem [shape: s32[16,1], index: 0, kind: input, shape index: {}]   ;;  %s370_s1 = inlined_call_operand.vmem [shape: s32[16,1], index: 1, kind: input, shape index: {}]   ;;  %s371_s2 = inlined_call_operand.hbm [shape: f32[64,128], index: 2, kind: input, shape index: {}]   ;;  %s372_s3 = inlined_call_operand.vmem [shape: f32[1,128], index: 3, kind: input, shape index: {}]   ;;  %s373_s4 = inlined_call_operand.<no memory space> [shape: f32[1], index: 4, kind: input, shape index: {}]   ;;  %s374_s5 = inlined_call_operand.hbm [shape: f32[1,2], index: 5, kind: output, shape index: {}]  }
   0x1   :  { %12 = vsyncpa [#allocation5], 0  ;;  %s309_s18 = smov [#allocation3]  }
   0x2   :  { %s22_s19 = sshll.u32 %s309_s18, 4  ;;  %s23_s19 = int_to_ptr.vmem [resolvable:$true] %s22_s19 }
   0x3   :  { %s273_s20 = scalar_lea.vmem %s23_s19, 1024  ;;  %p278_p1 = scmp.lt.s32.totalorder %s23_s19, %s23_s19 }
   0x4   :  { %p274_p0 = scmp.ne.s32.totalorder %s23_s19, %s273_s20  ;;  %p279_p2 = scmp.lt.s32.totalorder %s273_s20, %s273_s20 }
   0x6   :  { %p280_p3 = por %p279_p2, %p278_p1 }
   0x8   :  { %p281_p4 = pnand %p280_p3, %p274_p0 }
   0xa   :  { %284 = shalt.err (!%p281_p4)
}
   0xb   :  { %s310_s21 = smov 128   ;;  %s311_s22 = smov 8  }
   0xc   :  { %28 = dma.hbm_to_vmem [thread:$0]  %s371_s2, 1024, %s23_s19, [#allocation4], %s310_s21, %s310_s21, %s311_s22  }
   0xd   :  { %305 = dma.done.wait [#allocation4], 1024  }
   0xe   :  { %306 = vsyncadd [#allocation4], 4294966272  ;;  %v312_v0 = vmov 0   ;;  %v36_v1 = vld [vmem:[%s369_s0] sm:$0xff]  ;;  %v37_v2 = vld [vmem:[%s369_s0 + $0x8] sm:$0xff]  ;;  %v46_v19 = vlaneseq  ;;  %vm68_vm6 = vcmask 523264   ;;  %v198_v51 = vstv %s373_s4 }
   0xf   :  { %263 = vset.pattern.permute.xlu0 %v312_v0  ;;  %264 = vset.pattern.permute.xlu1 %v312_v0  ;;  %v67_v3 = vld [vmem:[#allocation3 + $0x38] sm:$0xff]  ;;  %vm38_vm0 = vcmp.gt.s32.totalorder %v36_v1, 0  ;;  %vm40_vm1 = vcmp.gt.s32.totalorder %v37_v2, 0  ;;  %v66_v4 = vld [vmem:[#allocation3 + $0x30] sm:$0xff]  ;;  %v65_v7 = vld [vmem:[#allocation3 + $0x28] sm:$0xff]  ;;  %v313_v22 = vmov 0.0  }
  0x10   :  { %238 = vmatprep.subr.mxu0 %v67_v3  ;;  %v39_v5 = vsel %vm38_vm0, %v36_v1, 0  ;;  %v41_v6 = vsel %vm40_vm1, %v37_v2, 0  ;;  %v64_v9 = vld [vmem:[#allocation3 + $0x20] sm:$0xff]  ;;  %v63_v11 = vld [vmem:[#allocation3 + $0x18] sm:$0xff]  ;;  %v151_v12 = vld [vmem:[%s370_s1 + $0x8] sm:$0xff]  ;;  %v47_v20 = vand.u32 127, %v46_v19 }
  0x11   :  { %239 = vmatpush3.msra.mxu0 %v67_v3  ;;  %vm42_vm2 = vcmp.lt.s32.totalorder %v39_v5, 63  ;;  %vm44_vm3 = vcmp.lt.s32.totalorder %v41_v6, 63  ;;  %v150_v13 = vld [vmem:[%s370_s1] sm:$0xff]  ;;  %v62_v14 = vld [vmem:[#allocation3 + $0x10] sm:$0xff]  ;;  %vm153_vm4 = vcmp.ne.s32.totalorder %v151_v12, 0  ;;  %v61_v16 = vld [vmem:[#allocation3 + $0x8] sm:$0xff] }
  0x12   :  { %240 = vmatprep.subr.mxu0 %v66_v4  ;;  %v43_v8 = vsel %vm42_vm2, %v39_v5, 63  ;;  %v45_v10 = vsel %vm44_vm3, %v41_v6, 63  ;;  %vm152_vm5 = vcmp.ne.s32.totalorder %v150_v13, 0  ;;  %v155_v15 = vsel %vm153_vm4, 1, %v312_v0  ;;  %v60_v18 = vld [vmem:[#allocation3] sm:$0xff]  ;;  %s314_s9 = smov [#allocation6]  }
  0x13   :  { %241 = vmatpush3.msra.mxu0 %v66_v4  ;;  %49 = vperm.xlu0 %263, %v43_v8   ;;  %v154_v17 = vsel %vm152_vm5, 1, %v312_v0  ;;  %v227_v41 = vld [vmem:[%s372_s3] ss:$0 sm:$0xff]  ;;  %vm190_vm11 = vcmask 1041409   ;;  %vm193_vm12 = vcmask 1041408   ;;  %v202_v50 = vshrl.u32 %v46_v19, 7 }
  0x14   :  { %242 = vmatprep.subr.mxu0 %v65_v7  ;;  %160 = vperm.xlu1 %264, %v155_v15   ;;  %s214_s3 = sshll.u32 %s314_s9, 4  ;;  %vm206_vm13 = vcmask 8192   ;;  %s215_s3 = int_to_ptr.vmem [resolvable:$true] %s214_s3 }
  0x15   :  { %243 = vmatpush3.msra.mxu0 %v65_v7  ;;  %v203_v52 = vsub.s32 %v47_v20, %v202_v50  ;;  %s285_s10 = scalar_lea.vmem %s215_s3, 16  ;;  %s289_s11 = scalar_lea.vmem %s215_s3, 32 }
  0x16   :  { %244 = vmatprep.subr.mxu0 %v64_v9  ;;  %p286_p5 = scmp.ne.s32.totalorder %s215_s3, %s285_s10  ;;  %p290_p6 = scmp.lt.s32.totalorder %s215_s3, %s215_s3 }
  0x17   :  { %245 = vmatpush3.msra.mxu0 %v64_v9  ;;  %52 = vperm.xlu0 %263, %v45_v10   ;;  %p291_p7 = scmp.lt.s32.totalorder %s289_s11, %s285_s10 }
  0x18   :  { %246 = vmatprep.subr.mxu0 %v63_v11  ;;  %157 = vperm.xlu1 %264, %v154_v17  }
  0x19   :  { %247 = vmatpush3.msra.mxu0 %v63_v11  ;;  %p292_p8 = por %p291_p7, %p290_p6 }
  0x1a   :  { %248 = vmatprep.subr.mxu0 %v62_v14 }
  0x1b   :  { %249 = vmatpush3.msra.mxu0 %v62_v14  ;;  %p293_p9 = pnand %p292_p8, %p286_p5 }
  0x1c   :  { %250 = vmatprep.subr.mxu0 %v61_v16 }
  0x1d   :  { %251 = vmatpush3.msra.mxu0 %v61_v16 }
  0x1e   :  { %252 = vmatprep.subr.mxu0 %v60_v18 }
  0x1f   :  { %253 = vmatpush3.msra.mxu0 %v60_v18 }
  0x8e   :  { %v50_v21 = vpop.permute.xlu0 %49 }
  0x8f   :  { %vm54_vm7 = vcmp.eq.s32.totalorder %v47_v20, %v50_v21  ;;  %v161_v26 = vpop.permute.xlu1 %160 }
  0x90   :  { %v223_v23 = vsel %vm54_vm7, 1.0, %v313_v22  ;;  %vm163_vm9 = vcmp.eq.s32.totalorder %v161_v26, 1 }
  0x91   :  { %254 = vmatprep.mubr.msk.f32.mxu0 %vm68_vm6, %v223_v23 }
  0x92   :  { %v53_v24 = vpop.permute.xlu0 %52 }
  0x93   :  { %vm55_vm8 = vcmp.eq.s32.totalorder %v47_v20, %v53_v24  ;;  %v158_v27 = vpop.permute.xlu1 %157 }
  0x94   :  { %v224_v25 = vsel %vm55_vm8, 1.0, %v313_v22  ;;  %vm162_vm10 = vcmp.eq.s32.totalorder %v158_v27, 1 }
  0x95   :  { %255 = vmatmul.mubr.msk.f32.vlgmr.msra.gmra.mxu0 %vm68_vm6, %v224_v25 }
 0x155   :  { %v256_v28 = vpop.f32.mrf.mxu0 }
 0x156   :  { %v165_v29 = vsel %vm163_vm9, %v256_v28, -1e+09 }
 0x157   :  { %v172_v30 = vrot.slane %v165_v29, 4  ;;  %v141_v31 = vpop.f32.mrf.mxu0 }
 0x158   :  { %v164_v32 = vsel %vm162_vm10, %v141_v31, -1e+09 }
 0x159   :  { %v173_v33 = vmax.f32 %v165_v29, %v172_v30  ;;  %v166_v34 = vrot.slane %v164_v32, 4 }
 0x15b   :  { %v174_v35 = vrot.slane %v173_v33, 2  ;;  %v167_v36 = vmax.f32 %v164_v32, %v166_v34 }
 0x15d   :  { %v175_v37 = vmax.f32 %v173_v33, %v174_v35  ;;  %v168_v38 = vrot.slane %v167_v36, 2 }
 0x15f   :  { %v176_v39 = vrot.slane %v175_v37, 1  ;;  %v169_v40 = vmax.f32 %v167_v36, %v168_v38 }
 0x161   :  { %v177_v42 = vmax.f32 %v175_v37, %v176_v39  ;;  %v170_v43 = vrot.slane %v169_v40, 1 }
 0x163   :  { %v171_v44 = vmax.f32 %v169_v40, %v170_v43  ;;  %v186_v45 = vmul.f32 %v227_v41, %v177_v42 }
 0x165   :  { %v185_v46 = vmul.f32 %v227_v41, %v171_v44  ;;  %v189_v47 = vrot.slane %v186_v45, 7 }
 0x167   :  { %v191_v48 = vsel %vm190_vm11, %v189_v47, %v185_v46 }
 0x168   :  { %v194_v49 = vsel %vm193_vm12, %v191_v48, 0.0 }
 0x169   :  { %195 = vadd.xlane.f32.xlu0 %v194_v49 }
 0x1f2   :  { %v196_v53 = vpop.xlane.xlu0 %195 }
 0x1f3   :  { %v199_v54 = vadd.f32 %v198_v51, %v196_v53 }
 0x1f5   :  { %v204_v55 = vrot.slane %v199_v54, %v203_v52 }
 0x1f7   :  { %207 = vst.msk [vmem:[#allocation6] sm:$0x1] %vm206_vm13, %v204_v55 }
 0x1f8   :  { %296 = shalt.err (!%p293_p9)
}
 0x1f9   :  { %217 = dma.vmem_to_hbm [thread:$0]  %s215_s3, 16, %s374_s5, [#allocation5]  }
 0x1fa   :  { %307 = dma.done.wait [#allocation5], 16  }
 0x1fb   :  { %308 = vsyncadd [#allocation5], 4294967280 }
 0x1fc   :  { %221 = vsyncpa [#allocation4], 1 }
 0x1fd   :  { %222 = vsyncpa [#allocation5], 1 }

</bundles_post_ra>
